<compile_context>
chip_gen: v5e
topology: v5e:2x2
jax: 0.10.0
libtpu: 0.0.40
codegen_flags: <defaults>
</compile_context>

<pallas_src>
import functools

import jax
import jax.numpy as jnp
from jax.experimental import pallas as pl
from jax.experimental.pallas import tpu as pltpu


# ---------------------------------------------------------------------------
# shared in-kernel helpers
# ---------------------------------------------------------------------------
def _stage_padded(x_ref, xpad_ref, *, pad, length):
    """Copy the (B_TILE, C_in, L) tile into the zero-padded VMEM scratch."""
    if pad > 0:
        b_tile, c_in = x_ref.shape[0], x_ref.shape[1]
        zeros = jnp.zeros((b_tile, c_in, pad), jnp.float32)
        # Tiny masked stores; re-done every step so megacore/parallel scheduling of the
        # batch-block axis never sees uninitialized pad columns.
        xpad_ref[:, :, 0:pad] = zeros
        xpad_ref[:, :, pad + length:pad + length + pad] = zeros
        xpad_ref[:, :, pad:pad + length] = x_ref[...]
    else:
        xpad_ref[...] = x_ref[...]


def _depthwise_sample(xpad_ref, dw, b, *, kernel, stride, l_out):
    """Depthwise conv for sample `b`, evaluated directly at the strided output grid."""
    acc = None
    for k in range(kernel):                       # K is tiny -> static unroll
        if stride == 1:
            tap = xpad_ref[b, :, k:k + l_out]     # contiguous ref-level slice
        else:
            # TODO(synk): ref-level strided read; the stride>1 path is not exercised by
            # the test below -- verify lowering/perf before production use.
            tap = xpad_ref[b, :, pl.ds(k, l_out, stride=stride)]
        term = dw[:, k:k + 1] * tap               # (C_in, L_out) VPU broadcast-FMA
        acc = term if acc is None else acc + term
    return acc                                    # (C_in, L_out) f32


# ---------------------------------------------------------------------------
# pass 1: bias-free conv + per-block partial BatchNorm statistics
# ---------------------------------------------------------------------------
def _stats_kernel(x_ref, dw_ref, pw_ref, st_ref, xpad_ref, *,
                  kernel, stride, pad, length, l_out, b_tile):
    _stage_padded(x_ref, xpad_ref, pad=pad, length=length)
    dw = dw_ref[...]                              # (C_in, K)
    pw = pw_ref[...]                              # (C_out, C_in)
    c_out = pw.shape[0]

    s1 = jnp.zeros((c_out, 1), jnp.float32)
    s2 = jnp.zeros((c_out, 1), jnp.float32)
    for b in range(b_tile):                       # static unroll over the batch tile
        y = _depthwise_sample(xpad_ref, dw, b, kernel=kernel, stride=stride, l_out=l_out)
        z = jnp.dot(pw, y, preferred_element_type=jnp.float32)   # MXU contraction
        s1 = s1 + jnp.sum(z, axis=1, keepdims=True)
        s2 = s2 + jnp.sum(z * z, axis=1, keepdims=True)

    st_ref[:, 0:1] = s1                           # one tiny (C_out, 2) row per block
    st_ref[:, 1:2] = s2


# ---------------------------------------------------------------------------
# pass 2: recompute conv, apply folded BatchNorm scale/shift + ReLU
# ---------------------------------------------------------------------------
def _apply_kernel(x_ref, dw_ref, pws_ref, shift_ref, o_ref, xpad_ref, *,
                  kernel, stride, pad, length, l_out, b_tile):
    _stage_padded(x_ref, xpad_ref, pad=pad, length=length)
    dw = dw_ref[...]                              # (C_in, K)
    pws = pws_ref[...]                            # (C_out, C_in) = pw * inv_std
    shift = shift_ref[...]                        # (C_out, 1)    = -mean * inv_std

    for b in range(b_tile):
        y = _depthwise_sample(xpad_ref, dw, b, kernel=kernel, stride=stride, l_out=l_out)
        z = jnp.dot(pws, y, preferred_element_type=jnp.float32) + shift
        o_ref[b] = jnp.maximum(z, 0.0).astype(o_ref.dtype)


# ---------------------------------------------------------------------------
# wrapper
# ---------------------------------------------------------------------------
def _pick_batch_tile(n, per_sample_bytes, *, cap=8, budget_bytes=8 << 20):
    """Largest divisor of n (<= cap) whose tile footprint stays within a VMEM budget
    that is safe on every generation (v7x has only 64 MiB physical VMEM)."""
    best = 1
    for bt in range(1, min(n, cap) + 1):
        if n % bt == 0 and bt * per_sample_bytes <= budget_bytes:
            best = bt
    return best


@functools.partial(jax.jit, static_argnames=("kernel", "stride", "eps"))
def subblock_r(x, dw, db, pw, pb, *, kernel, stride=1, eps=1e-5):
    """x: (N, C_in, L).  Returns (N, C_out, floor((L-1)/stride)+1) float32.

    db / pb are accepted for interface parity with the PyTorch module but are provably
    no-ops: BatchNorm1d(affine=False) subtracts the per-channel batch mean, which
    removes any per-channel constant added by the conv biases.
    """
    del db, pb  # cancelled exactly by affine=False BatchNorm (see docstring)

    if kernel % 2 == 0:
        raise NotImplementedError(
            "even kernel sizes change the PyTorch output length; only odd K supported")

    n, c_in, length = x.shape
    c_out = pw.shape[0]
    pad = (kernel - 1) // 2
    l_out = (length - 1) // stride + 1

    x = x.astype(jnp.float32)
    dw = dw.astype(jnp.float32).reshape(c_in, kernel)     # accepts (C_in,1,K) too
    pw = pw.astype(jnp.float32).reshape(c_out, c_in)      # accepts (C_out,C_in,1) too

    # double-buffered x/out tiles + padded scratch, per sample, in bytes
    per_sample_bytes = 4 * (2 * c_in * length + 2 * c_out * l_out
                            + c_in * (length + 2 * pad))
    b_tile = _pick_batch_tile(n, per_sample_bytes)
    n_blocks = n // b_tile

    cparams = pltpu.CompilerParams(
        dimension_semantics=("parallel",),        # batch blocks are independent
        vmem_limit_bytes=32 * 1024 * 1024,        # safe on v5e/v6e and v7x's 64 MiB VMEM
    )

    # ---- pass 1: partial BN statistics of the bias-free conv output ----
    stats_cost = pl.CostEstimate(
        flops=n * l_out * (2 * c_in * kernel + 2 * c_out * c_in + 4 * c_out),
        transcendentals=0,
        bytes_accessed=4 * (n * c_in * length + n_blocks * c_out * 2
                            + c_in * kernel + c_out * c_in),
    )
    kfn1 = functools.partial(_stats_kernel, kernel=kernel, stride=stride, pad=pad,
                             length=length, l_out=l_out, b_tile=b_tile)
    stats = pl.pallas_call(
        kfn1,
        grid=(n_blocks,),
        out_shape=jax.ShapeDtypeStruct((n_blocks, c_out, 2), jnp.float32),
        in_specs=[
            pl.BlockSpec((b_tile, c_in, length), lambda blk: (blk, 0, 0)),
            pl.BlockSpec((c_in, kernel), lambda blk: (0, 0)),
            pl.BlockSpec((c_out, c_in), lambda blk: (0, 0)),
        ],
        out_specs=pl.BlockSpec((None, c_out, 2), lambda blk: (blk, 0, 0)),
        scratch_shapes=[pltpu.VMEM((b_tile, c_in, length + 2 * pad), jnp.float32)],
        compiler_params=cparams,
        cost_estimate=stats_cost,
    )(x, dw, pw)

    # ---- tiny glue: global stats -> folded scale/shift (plain JAX) ----
    s = jnp.sum(stats, axis=0)                            # (C_out, 2)
    count = float(n * l_out)
    mean = s[:, 0] / count
    var = jnp.maximum(s[:, 1] / count - mean * mean, 0.0)
    inv_std = jax.lax.rsqrt(var + eps)
    pw_scaled = pw * inv_std[:, None]                     # fold 1/std into the weights
    shift = (-mean * inv_std).reshape(c_out, 1)           # per-channel shift

    # ---- pass 2: recompute conv, apply BN + ReLU, write the output ----
    apply_cost = pl.CostEstimate(
        flops=n * l_out * (2 * c_in * kernel + 2 * c_out * c_in + 2 * c_out),
        transcendentals=0,
        bytes_accessed=4 * (n * c_in * length + n * c_out * l_out
                            + c_in * kernel + c_out * c_in + c_out),
    )
    kfn2 = functools.partial(_apply_kernel, kernel=kernel, stride=stride, pad=pad,
                             length=length, l_out=l_out, b_tile=b_tile)
    out = pl.pallas_call(
        kfn2,
        grid=(n_blocks,),
        out_shape=jax.ShapeDtypeStruct((n, c_out, l_out), jnp.float32),
        in_specs=[
            pl.BlockSpec((b_tile, c_in, length), lambda blk: (blk, 0, 0)),
            pl.BlockSpec((c_in, kernel), lambda blk: (0, 0)),
            pl.BlockSpec((c_out, c_in), lambda blk: (0, 0)),
            pl.BlockSpec((c_out, 1), lambda blk: (0, 0)),
        ],
        out_specs=pl.BlockSpec((b_tile, c_out, l_out), lambda blk: (blk, 0, 0)),
        scratch_shapes=[pltpu.VMEM((b_tile, c_in, length + 2 * pad), jnp.float32)],
        compiler_params=cparams,
        cost_estimate=apply_cost,
    )(x, dw, pw_scaled, shift)
    return out


# ---------------------------------------------------------------------------
# pure-JAX reference of the same forward pass (training-mode BN, ReLU)
# ---------------------------------------------------------------------------
def _reference(x, dw, db, pw, pb, *, kernel, stride=1, eps=1e-5):
    n, c_in, length = x.shape
    pad = (kernel - 1) // 2
    xp = jnp.pad(x, ((0, 0), (0, 0), (pad, pad)))
    y = jnp.zeros((n, c_in, length), jnp.float32)
    for k in range(kernel):
        y = y + dw[:, k][None, :, None] * xp[:, :, k:k + length]
    y = y + db[None, :, None]
    if stride > 1:
        y = y[:, :, ::stride]
    z = jnp.einsum('oc,ncl->nol', pw, y) + pb[None, :, None]
    mean = jnp.mean(z, axis=(0, 2), keepdims=True)
    var = jnp.mean((z - mean) ** 2, axis=(0, 2), keepdims=True)
    z = (z - mean) / jnp.sqrt(var + eps)
    return jnp.maximum(z, 0.0)


if __name__ == "__main__":
    # small shapes consistent with the module: Conv1d => (N, C, L)
    N, C_IN, C_OUT, L, KERNEL, STRIDE = 2, 4, 8, 16, 3, 1

    key = jax.random.PRNGKey(0)
    kx, k1, k2, k3, k4 = jax.random.split(key, 5)

    x = jax.random.normal(kx, (N, C_IN, L), jnp.float32)

    # parameter shapes mirroring the PyTorch module:
    # depthwise Conv1d(C_IN, C_IN, K, groups=C_IN): weight (C_IN, 1, K) -> (C_IN, K)
    dw = 0.3 * jax.random.normal(k1, (C_IN, KERNEL), jnp.float32)
    db = 0.1 * jax.random.normal(k2, (C_IN,), jnp.float32)
    # pointwise Conv1d(C_IN, C_OUT, 1, stride): weight (C_OUT, C_IN, 1) -> (C_OUT, C_IN)
    pw = 0.3 * jax.random.normal(k3, (C_OUT, C_IN), jnp.float32)
    pb = 0.1 * jax.random.normal(k4, (C_OUT,), jnp.float32)

    out = subblock_r(x, dw, db, pw, pb, kernel=KERNEL, stride=STRIDE)
    out = jax.block_until_ready(out)

    ref = _reference(x, dw, db, pw, pb, kernel=KERNEL, stride=STRIDE)
    assert out.shape == (N, C_OUT, (L - 1) // STRIDE + 1)
    assert jnp.allclose(out, ref, atol=1e-4, rtol=1e-4), "mismatch vs reference"

    print("KERNEL_OK")
</pallas_src>

<mosaic_0001>
module attributes {stable_mosaic.version = 11 : i64} {
  func.func @_stats_kernel(%arg0: i32, %arg1: memref<2x4x16xf32, #tpu.memory_space<vmem>>, %arg2: memref<4x3xf32, #tpu.memory_space<vmem>>, %arg3: memref<8x4xf32, #tpu.memory_space<vmem>>, %arg4: memref<1x8x2xf32, #tpu.memory_space<vmem>>, %arg5: memref<2x4x18xf32, #tpu.memory_space<vmem>>) attributes {dimension_semantics = [#tpu.dimension_semantics<parallel>], iteration_bounds = array<i64: 1>, scalar_prefetch = 0 : i64, scratch_operands = 1 : i64, tpu.core_type = #tpu.core_type<tc>, window_params = [{transform_indices = @transform_0, window_bounds = array<i64: 2, 4, 16>}, {pipeline_mode = #tpu.pipeline_mode<synchronous>, transform_indices = @transform_1, window_bounds = array<i64: 4, 3>}, {pipeline_mode = #tpu.pipeline_mode<synchronous>, transform_indices = @transform_2, window_bounds = array<i64: 8, 4>}, {transform_indices = @transform_3, window_bounds = array<i64: 1, 8, 2>}]} {
    %cst = arith.constant 0.000000e+00 : f32
    %0 = vector.broadcast %cst : f32 to vector<2x4x1xf32>
    %c0 = arith.constant 0 : index
    %c0_0 = arith.constant 0 : index
    %c0_1 = arith.constant 0 : index
    %1 = vector.load %arg5[%c0, %c0_0, %c0_1] : memref<2x4x18xf32, #tpu.memory_space<vmem>>, vector<2x4x1xf32>
    tpu.vector_store %arg5[%c0, %c0_0, %c0_1], %0 {strides = array<i32>} : memref<2x4x18xf32, #tpu.memory_space<vmem>>, vector<2x4x1xf32>,
    %c0_2 = arith.constant 0 : index
    %c0_3 = arith.constant 0 : index
    %c17 = arith.constant 17 : index
    %2 = vector.load %arg5[%c0_2, %c0_3, %c17] : memref<2x4x18xf32, #tpu.memory_space<vmem>>, vector<2x4x1xf32>
    tpu.vector_store %arg5[%c0_2, %c0_3, %c17], %0 {strides = array<i32>} : memref<2x4x18xf32, #tpu.memory_space<vmem>>, vector<2x4x1xf32>,
    %c0_4 = arith.constant 0 : index
    %c0_5 = arith.constant 0 : index
    %c0_6 = arith.constant 0 : index
    %3 = vector.load %arg1[%c0_4, %c0_5, %c0_6] : memref<2x4x16xf32, #tpu.memory_space<vmem>>, vector<2x4x16xf32>
    %c0_7 = arith.constant 0 : index
    %c0_8 = arith.constant 0 : index
    %c1 = arith.constant 1 : index
    %4 = vector.load %arg5[%c0_7, %c0_8, %c1] : memref<2x4x18xf32, #tpu.memory_space<vmem>>, vector<2x4x16xf32>
    tpu.vector_store %arg5[%c0_7, %c0_8, %c1], %3 {strides = array<i32>} : memref<2x4x18xf32, #tpu.memory_space<vmem>>, vector<2x4x16xf32>,
    %c0_9 = arith.constant 0 : index
    %c0_10 = arith.constant 0 : index
    %5 = vector.load %arg2[%c0_9, %c0_10] : memref<4x3xf32, #tpu.memory_space<vmem>>, vector<4x3xf32>
    %c0_11 = arith.constant 0 : index
    %c0_12 = arith.constant 0 : index
    %6 = vector.load %arg3[%c0_11, %c0_12] : memref<8x4xf32, #tpu.memory_space<vmem>>, vector<8x4xf32>
    %cst_13 = arith.constant 0.000000e+00 : f32
    %7 = vector.broadcast %cst_13 : f32 to vector<8x1xf32>
    %cst_14 = arith.constant 0.000000e+00 : f32
    %8 = vector.broadcast %cst_14 : f32 to vector<8x1xf32>
    %c0_15 = arith.constant 0 : index
    %c0_16 = arith.constant 0 : index
    %c0_17 = arith.constant 0 : index
    %9 = vector.load %arg5[%c0_15, %c0_16, %c0_17] : memref<2x4x18xf32, #tpu.memory_space<vmem>>, vector<1x4x16xf32>
    %10 = vector.shape_cast %9 : vector<1x4x16xf32> to vector<4x16xf32>
    %11 = vector.extract_strided_slice %5 {offsets = [0, 0], sizes = [4, 1], strides = [1, 1]} : vector<4x3xf32> to vector<4x1xf32>
    %12 = vector.broadcast %11 : vector<4x1xf32> to vector<4x16xf32>
    %13 = arith.mulf %12, %10 : vector<4x16xf32>
    %c0_18 = arith.constant 0 : index
    %c0_19 = arith.constant 0 : index
    %c1_20 = arith.constant 1 : index
    %14 = vector.load %arg5[%c0_18, %c0_19, %c1_20] : memref<2x4x18xf32, #tpu.memory_space<vmem>>, vector<1x4x16xf32>
    %15 = vector.shape_cast %14 : vector<1x4x16xf32> to vector<4x16xf32>
    %16 = vector.extract_strided_slice %5 {offsets = [0, 1], sizes = [4, 1], strides = [1, 1]} : vector<4x3xf32> to vector<4x1xf32>
    %17 = vector.broadcast %16 : vector<4x1xf32> to vector<4x16xf32>
    %18 = arith.mulf %17, %15 : vector<4x16xf32>
    %19 = arith.addf %13, %18 : vector<4x16xf32>
    %c0_21 = arith.constant 0 : index
    %c0_22 = arith.constant 0 : index
    %c2 = arith.constant 2 : index
    %20 = vector.load %arg5[%c0_21, %c0_22, %c2] : memref<2x4x18xf32, #tpu.memory_space<vmem>>, vector<1x4x16xf32>
    %21 = vector.shape_cast %20 : vector<1x4x16xf32> to vector<4x16xf32>
    %22 = vector.extract_strided_slice %5 {offsets = [0, 2], sizes = [4, 1], strides = [1, 1]} : vector<4x3xf32> to vector<4x1xf32>
    %23 = vector.broadcast %22 : vector<4x1xf32> to vector<4x16xf32>
    %24 = arith.mulf %23, %21 : vector<4x16xf32>
    %25 = arith.addf %19, %24 : vector<4x16xf32>
    %cst_23 = arith.constant dense<0.000000e+00> : vector<8x16xf32>
    %26 = tpu.matmul %6, %25, %cst_23 {dimension_numbers = #tpu.dot_dimension_numbers<[1], [0], [0], [1], [0, 0, 1, 1], [], []>} : vector<8x4xf32>, vector<4x16xf32>, vector<8x16xf32> -> vector<8x16xf32>
    %cst_24 = arith.constant dense<0.000000e+00> : vector<8xf32>
    %27 = vector.multi_reduction <add>, %26, %cst_24 [1] : vector<8x16xf32> to vector<8xf32>
    %28 = vector.shape_cast %27 : vector<8xf32> to vector<8x1xf32>
    %29 = arith.addf %7, %28 : vector<8x1xf32>
    %30 = arith.mulf %26, %26 : vector<8x16xf32>
    %cst_25 = arith.constant dense<0.000000e+00> : vector<8xf32>
    %31 = vector.multi_reduction <add>, %30, %cst_25 [1] : vector<8x16xf32> to vector<8xf32>
    %32 = vector.shape_cast %31 : vector<8xf32> to vector<8x1xf32>
    %33 = arith.addf %8, %32 : vector<8x1xf32>
    %c1_26 = arith.constant 1 : index
    %c0_27 = arith.constant 0 : index
    %c0_28 = arith.constant 0 : index
    %34 = vector.load %arg5[%c1_26, %c0_27, %c0_28] : memref<2x4x18xf32, #tpu.memory_space<vmem>>, vector<1x4x16xf32>
    %35 = vector.shape_cast %34 : vector<1x4x16xf32> to vector<4x16xf32>
    %36 = vector.extract_strided_slice %5 {offsets = [0, 0], sizes = [4, 1], strides = [1, 1]} : vector<4x3xf32> to vector<4x1xf32>
    %37 = vector.broadcast %36 : vector<4x1xf32> to vector<4x16xf32>
    %38 = arith.mulf %37, %35 : vector<4x16xf32>
    %c1_29 = arith.constant 1 : index
    %c0_30 = arith.constant 0 : index
    %c1_31 = arith.constant 1 : index
    %39 = vector.load %arg5[%c1_29, %c0_30, %c1_31] : memref<2x4x18xf32, #tpu.memory_space<vmem>>, vector<1x4x16xf32>
    %40 = vector.shape_cast %39 : vector<1x4x16xf32> to vector<4x16xf32>
    %41 = vector.extract_strided_slice %5 {offsets = [0, 1], sizes = [4, 1], strides = [1, 1]} : vector<4x3xf32> to vector<4x1xf32>
    %42 = vector.broadcast %41 : vector<4x1xf32> to vector<4x16xf32>
    %43 = arith.mulf %42, %40 : vector<4x16xf32>
    %44 = arith.addf %38, %43 : vector<4x16xf32>
    %c1_32 = arith.constant 1 : index
    %c0_33 = arith.constant 0 : index
    %c2_34 = arith.constant 2 : index
    %45 = vector.load %arg5[%c1_32, %c0_33, %c2_34] : memref<2x4x18xf32, #tpu.memory_space<vmem>>, vector<1x4x16xf32>
    %46 = vector.shape_cast %45 : vector<1x4x16xf32> to vector<4x16xf32>
    %47 = vector.extract_strided_slice %5 {offsets = [0, 2], sizes = [4, 1], strides = [1, 1]} : vector<4x3xf32> to vector<4x1xf32>
    %48 = vector.broadcast %47 : vector<4x1xf32> to vector<4x16xf32>
    %49 = arith.mulf %48, %46 : vector<4x16xf32>
    %50 = arith.addf %44, %49 : vector<4x16xf32>
    %cst_35 = arith.constant dense<0.000000e+00> : vector<8x16xf32>
    %51 = tpu.matmul %6, %50, %cst_35 {dimension_numbers = #tpu.dot_dimension_numbers<[1], [0], [0], [1], [0, 0, 1, 1], [], []>} : vector<8x4xf32>, vector<4x16xf32>, vector<8x16xf32> -> vector<8x16xf32>
    %cst_36 = arith.constant dense<0.000000e+00> : vector<8xf32>
    %52 = vector.multi_reduction <add>, %51, %cst_36 [1] : vector<8x16xf32> to vector<8xf32>
    %53 = vector.shape_cast %52 : vector<8xf32> to vector<8x1xf32>
    %54 = arith.addf %29, %53 : vector<8x1xf32>
    %55 = arith.mulf %51, %51 : vector<8x16xf32>
    %cst_37 = arith.constant dense<0.000000e+00> : vector<8xf32>
    %56 = vector.multi_reduction <add>, %55, %cst_37 [1] : vector<8x16xf32> to vector<8xf32>
    %57 = vector.shape_cast %56 : vector<8xf32> to vector<8x1xf32>
    %58 = arith.addf %33, %57 : vector<8x1xf32>
    %c0_38 = arith.constant 0 : index
    %c0_39 = arith.constant 0 : index
    %c0_40 = arith.constant 0 : index
    %59 = vector.load %arg4[%c0_38, %c0_39, %c0_40] : memref<1x8x2xf32, #tpu.memory_space<vmem>>, vector<1x8x1xf32>
    %60 = vector.shape_cast %59 : vector<1x8x1xf32> to vector<8x1xf32>
    %61 = vector.shape_cast %54 : vector<8x1xf32> to vector<1x8x1xf32>
    tpu.vector_store %arg4[%c0_38, %c0_39, %c0_40], %61 {strides = array<i32>} : memref<1x8x2xf32, #tpu.memory_space<vmem>>, vector<1x8x1xf32>,
    %c0_41 = arith.constant 0 : index
    %c0_42 = arith.constant 0 : index
    %c1_43 = arith.constant 1 : index
    %62 = vector.load %arg4[%c0_41, %c0_42, %c1_43] : memref<1x8x2xf32, #tpu.memory_space<vmem>>, vector<1x8x1xf32>
    %63 = vector.shape_cast %62 : vector<1x8x1xf32> to vector<8x1xf32>
    %64 = vector.shape_cast %58 : vector<8x1xf32> to vector<1x8x1xf32>
    tpu.vector_store %arg4[%c0_41, %c0_42, %c1_43], %64 {strides = array<i32>} : memref<1x8x2xf32, #tpu.memory_space<vmem>>, vector<1x8x1xf32>,
    return
  }
  func.func @transform_0(%arg0: i32) -> (i32, i32, i32) {
    %c0_i32 = arith.constant 0 : i32
    %c0_i32_0 = arith.constant 0 : i32
    %c0_i32_1 = arith.constant 0 : i32
    return %arg0, %c0_i32, %c0_i32_0 : i32, i32, i32
  }
  func.func @transform_1(%arg0: i32) -> (i32, i32) {
    %c0_i32 = arith.constant 0 : i32
    %c0_i32_0 = arith.constant 0 : i32
    %c0_i32_1 = arith.constant 0 : i32
    return %c0_i32, %c0_i32_0 : i32, i32
  }
  func.func @transform_2(%arg0: i32) -> (i32, i32) {
    %c0_i32 = arith.constant 0 : i32
    %c0_i32_0 = arith.constant 0 : i32
    %c0_i32_1 = arith.constant 0 : i32
    return %c0_i32, %c0_i32_0 : i32, i32
  }
  func.func @transform_3(%arg0: i32) -> (i32, i32, i32) {
    %c0_i32 = arith.constant 0 : i32
    %c0_i32_0 = arith.constant 0 : i32
    %c0_i32_1 = arith.constant 0 : i32
    return %arg0, %c0_i32, %c0_i32_0 : i32, i32, i32
  }
}

module attributes {stable_mosaic.version = 11 : i64} {
  func.func @_apply_kernel(%arg0: i32, %arg1: memref<2x4x16xf32, #tpu.memory_space<vmem>>, %arg2: memref<4x3xf32, #tpu.memory_space<vmem>>, %arg3: memref<8x4xf32, #tpu.memory_space<vmem>>, %arg4: memref<8x1xf32, #tpu.memory_space<vmem>>, %arg5: memref<2x8x16xf32, #tpu.memory_space<vmem>>, %arg6: memref<2x4x18xf32, #tpu.memory_space<vmem>>) attributes {dimension_semantics = [#tpu.dimension_semantics<parallel>], iteration_bounds = array<i64: 1>, scalar_prefetch = 0 : i64, scratch_operands = 1 : i64, tpu.core_type = #tpu.core_type<tc>, window_params = [{transform_indices = @transform_0, window_bounds = array<i64: 2, 4, 16>}, {pipeline_mode = #tpu.pipeline_mode<synchronous>, transform_indices = @transform_1, window_bounds = array<i64: 4, 3>}, {pipeline_mode = #tpu.pipeline_mode<synchronous>, transform_indices = @transform_2, window_bounds = array<i64: 8, 4>}, {pipeline_mode = #tpu.pipeline_mode<synchronous>, transform_indices = @transform_3, window_bounds = array<i64: 8, 1>}, {transform_indices = @transform_4, window_bounds = array<i64: 2, 8, 16>}]} {
    %cst = arith.constant 0.000000e+00 : f32
    %0 = vector.broadcast %cst : f32 to vector<2x4x1xf32>
    %c0 = arith.constant 0 : index
    %c0_0 = arith.constant 0 : index
    %c0_1 = arith.constant 0 : index
    %1 = vector.load %arg6[%c0, %c0_0, %c0_1] : memref<2x4x18xf32, #tpu.memory_space<vmem>>, vector<2x4x1xf32>
    tpu.vector_store %arg6[%c0, %c0_0, %c0_1], %0 {strides = array<i32>} : memref<2x4x18xf32, #tpu.memory_space<vmem>>, vector<2x4x1xf32>,
    %c0_2 = arith.constant 0 : index
    %c0_3 = arith.constant 0 : index
    %c17 = arith.constant 17 : index
    %2 = vector.load %arg6[%c0_2, %c0_3, %c17] : memref<2x4x18xf32, #tpu.memory_space<vmem>>, vector<2x4x1xf32>
    tpu.vector_store %arg6[%c0_2, %c0_3, %c17], %0 {strides = array<i32>} : memref<2x4x18xf32, #tpu.memory_space<vmem>>, vector<2x4x1xf32>,
    %c0_4 = arith.constant 0 : index
    %c0_5 = arith.constant 0 : index
    %c0_6 = arith.constant 0 : index
    %3 = vector.load %arg1[%c0_4, %c0_5, %c0_6] : memref<2x4x16xf32, #tpu.memory_space<vmem>>, vector<2x4x16xf32>
    %c0_7 = arith.constant 0 : index
    %c0_8 = arith.constant 0 : index
    %c1 = arith.constant 1 : index
    %4 = vector.load %arg6[%c0_7, %c0_8, %c1] : memref<2x4x18xf32, #tpu.memory_space<vmem>>, vector<2x4x16xf32>
    tpu.vector_store %arg6[%c0_7, %c0_8, %c1], %3 {strides = array<i32>} : memref<2x4x18xf32, #tpu.memory_space<vmem>>, vector<2x4x16xf32>,
    %c0_9 = arith.constant 0 : index
    %c0_10 = arith.constant 0 : index
    %5 = vector.load %arg2[%c0_9, %c0_10] : memref<4x3xf32, #tpu.memory_space<vmem>>, vector<4x3xf32>
    %c0_11 = arith.constant 0 : index
    %c0_12 = arith.constant 0 : index
    %6 = vector.load %arg3[%c0_11, %c0_12] : memref<8x4xf32, #tpu.memory_space<vmem>>, vector<8x4xf32>
    %c0_13 = arith.constant 0 : index
    %c0_14 = arith.constant 0 : index
    %7 = vector.load %arg4[%c0_13, %c0_14] : memref<8x1xf32, #tpu.memory_space<vmem>>, vector<8x1xf32>
    %c0_15 = arith.constant 0 : index
    %c0_16 = arith.constant 0 : index
    %c0_17 = arith.constant 0 : index
    %8 = vector.load %arg6[%c0_15, %c0_16, %c0_17] : memref<2x4x18xf32, #tpu.memory_space<vmem>>, vector<1x4x16xf32>
    %9 = vector.shape_cast %8 : vector<1x4x16xf32> to vector<4x16xf32>
    %10 = vector.extract_strided_slice %5 {offsets = [0, 0], sizes = [4, 1], strides = [1, 1]} : vector<4x3xf32> to vector<4x1xf32>
    %11 = vector.broadcast %10 : vector<4x1xf32> to vector<4x16xf32>
    %12 = arith.mulf %11, %9 : vector<4x16xf32>
    %c0_18 = arith.constant 0 : index
    %c0_19 = arith.constant 0 : index
    %c1_20 = arith.constant 1 : index
    %13 = vector.load %arg6[%c0_18, %c0_19, %c1_20] : memref<2x4x18xf32, #tpu.memory_space<vmem>>, vector<1x4x16xf32>
    %14 = vector.shape_cast %13 : vector<1x4x16xf32> to vector<4x16xf32>
    %15 = vector.extract_strided_slice %5 {offsets = [0, 1], sizes = [4, 1], strides = [1, 1]} : vector<4x3xf32> to vector<4x1xf32>
    %16 = vector.broadcast %15 : vector<4x1xf32> to vector<4x16xf32>
    %17 = arith.mulf %16, %14 : vector<4x16xf32>
    %18 = arith.addf %12, %17 : vector<4x16xf32>
    %c0_21 = arith.constant 0 : index
    %c0_22 = arith.constant 0 : index
    %c2 = arith.constant 2 : index
    %19 = vector.load %arg6[%c0_21, %c0_22, %c2] : memref<2x4x18xf32, #tpu.memory_space<vmem>>, vector<1x4x16xf32>
    %20 = vector.shape_cast %19 : vector<1x4x16xf32> to vector<4x16xf32>
    %21 = vector.extract_strided_slice %5 {offsets = [0, 2], sizes = [4, 1], strides = [1, 1]} : vector<4x3xf32> to vector<4x1xf32>
    %22 = vector.broadcast %21 : vector<4x1xf32> to vector<4x16xf32>
    %23 = arith.mulf %22, %20 : vector<4x16xf32>
    %24 = arith.addf %18, %23 : vector<4x16xf32>
    %cst_23 = arith.constant dense<0.000000e+00> : vector<8x16xf32>
    %25 = tpu.matmul %6, %24, %cst_23 {dimension_numbers = #tpu.dot_dimension_numbers<[1], [0], [0], [1], [0, 0, 1, 1], [], []>} : vector<8x4xf32>, vector<4x16xf32>, vector<8x16xf32> -> vector<8x16xf32>
    %26 = vector.broadcast %7 : vector<8x1xf32> to vector<8x16xf32>
    %27 = arith.addf %25, %26 : vector<8x16xf32>
    %cst_24 = arith.constant 0.000000e+00 : f32
    %28 = vector.broadcast %cst_24 : f32 to vector<8x16xf32>
    %29 = arith.maximumf %27, %28 : vector<8x16xf32>
    %c0_25 = arith.constant 0 : index
    %c0_26 = arith.constant 0 : index
    %c0_27 = arith.constant 0 : index
    %30 = vector.load %arg5[%c0_25, %c0_26, %c0_27] : memref<2x8x16xf32, #tpu.memory_space<vmem>>, vector<1x8x16xf32>
    %31 = vector.shape_cast %30 : vector<1x8x16xf32> to vector<8x16xf32>
    %32 = vector.shape_cast %29 : vector<8x16xf32> to vector<1x8x16xf32>
    tpu.vector_store %arg5[%c0_25, %c0_26, %c0_27], %32 {strides = array<i32>} : memref<2x8x16xf32, #tpu.memory_space<vmem>>, vector<1x8x16xf32>,
    %c1_28 = arith.constant 1 : index
    %c0_29 = arith.constant 0 : index
    %c0_30 = arith.constant 0 : index
    %33 = vector.load %arg6[%c1_28, %c0_29, %c0_30] : memref<2x4x18xf32, #tpu.memory_space<vmem>>, vector<1x4x16xf32>
    %34 = vector.shape_cast %33 : vector<1x4x16xf32> to vector<4x16xf32>
    %35 = vector.extract_strided_slice %5 {offsets = [0, 0], sizes = [4, 1], strides = [1, 1]} : vector<4x3xf32> to vector<4x1xf32>
    %36 = vector.broadcast %35 : vector<4x1xf32> to vector<4x16xf32>
    %37 = arith.mulf %36, %34 : vector<4x16xf32>
    %c1_31 = arith.constant 1 : index
    %c0_32 = arith.constant 0 : index
    %c1_33 = arith.constant 1 : index
    %38 = vector.load %arg6[%c1_31, %c0_32, %c1_33] : memref<2x4x18xf32, #tpu.memory_space<vmem>>, vector<1x4x16xf32>
    %39 = vector.shape_cast %38 : vector<1x4x16xf32> to vector<4x16xf32>
    %40 = vector.extract_strided_slice %5 {offsets = [0, 1], sizes = [4, 1], strides = [1, 1]} : vector<4x3xf32> to vector<4x1xf32>
    %41 = vector.broadcast %40 : vector<4x1xf32> to vector<4x16xf32>
    %42 = arith.mulf %41, %39 : vector<4x16xf32>
    %43 = arith.addf %37, %42 : vector<4x16xf32>
    %c1_34 = arith.constant 1 : index
    %c0_35 = arith.constant 0 : index
    %c2_36 = arith.constant 2 : index
    %44 = vector.load %arg6[%c1_34, %c0_35, %c2_36] : memref<2x4x18xf32, #tpu.memory_space<vmem>>, vector<1x4x16xf32>
    %45 = vector.shape_cast %44 : vector<1x4x16xf32> to vector<4x16xf32>
    %46 = vector.extract_strided_slice %5 {offsets = [0, 2], sizes = [4, 1], strides = [1, 1]} : vector<4x3xf32> to vector<4x1xf32>
    %47 = vector.broadcast %46 : vector<4x1xf32> to vector<4x16xf32>
    %48 = arith.mulf %47, %45 : vector<4x16xf32>
    %49 = arith.addf %43, %48 : vector<4x16xf32>
    %cst_37 = arith.constant dense<0.000000e+00> : vector<8x16xf32>
    %50 = tpu.matmul %6, %49, %cst_37 {dimension_numbers = #tpu.dot_dimension_numbers<[1], [0], [0], [1], [0, 0, 1, 1], [], []>} : vector<8x4xf32>, vector<4x16xf32>, vector<8x16xf32> -> vector<8x16xf32>
    %51 = vector.broadcast %7 : vector<8x1xf32> to vector<8x16xf32>
    %52 = arith.addf %50, %51 : vector<8x16xf32>
    %cst_38 = arith.constant 0.000000e+00 : f32
    %53 = vector.broadcast %cst_38 : f32 to vector<8x16xf32>
    %54 = arith.maximumf %52, %53 : vector<8x16xf32>
    %c1_39 = arith.constant 1 : index
    %c0_40 = arith.constant 0 : index
    %c0_41 = arith.constant 0 : index
    %55 = vector.load %arg5[%c1_39, %c0_40, %c0_41] : memref<2x8x16xf32, #tpu.memory_space<vmem>>, vector<1x8x16xf32>
    %56 = vector.shape_cast %55 : vector<1x8x16xf32> to vector<8x16xf32>
    %57 = vector.shape_cast %54 : vector<8x16xf32> to vector<1x8x16xf32>
    tpu.vector_store %arg5[%c1_39, %c0_40, %c0_41], %57 {strides = array<i32>} : memref<2x8x16xf32, #tpu.memory_space<vmem>>, vector<1x8x16xf32>,
    return
  }
  func.func @transform_0(%arg0: i32) -> (i32, i32, i32) {
    %c0_i32 = arith.constant 0 : i32
    %c0_i32_0 = arith.constant 0 : i32
    %c0_i32_1 = arith.constant 0 : i32
    return %arg0, %c0_i32, %c0_i32_0 : i32, i32, i32
  }
  func.func @transform_1(%arg0: i32) -> (i32, i32) {
    %c0_i32 = arith.constant 0 : i32
    %c0_i32_0 = arith.constant 0 : i32
    %c0_i32_1 = arith.constant 0 : i32
    return %c0_i32, %c0_i32_0 : i32, i32
  }
  func.func @transform_2(%arg0: i32) -> (i32, i32) {
    %c0_i32 = arith.constant 0 : i32
    %c0_i32_0 = arith.constant 0 : i32
    %c0_i32_1 = arith.constant 0 : i32
    return %c0_i32, %c0_i32_0 : i32, i32
  }
  func.func @transform_3(%arg0: i32) -> (i32, i32) {
    %c0_i32 = arith.constant 0 : i32
    %c0_i32_0 = arith.constant 0 : i32
    %c0_i32_1 = arith.constant 0 : i32
    return %c0_i32, %c0_i32_0 : i32, i32
  }
  func.func @transform_4(%arg0: i32) -> (i32, i32, i32) {
    %c0_i32 = arith.constant 0 : i32
    %c0_i32_0 = arith.constant 0 : i32
    %c0_i32_1 = arith.constant 0 : i32
    return %arg0, %c0_i32, %c0_i32_0 : i32, i32, i32
  }
}

</mosaic_0001>

<bundles_post_ra>
// kernel: subblock_r.2
= control target key start
LH: loop header
LB: loop body
LE: loop exit
PB: predicated region body
PF: predicated region fallthrough
CT: control target
= control target key end

     0   :  { %vm14_vm0 = vcmask 3072   ;;  %v170_v0 = vmov 1   ;;  %v171_v3 = vmov 0   ;;  %s172_s16 = smov 1   ;;  %vm17_vm1 = vcmask 142472   ;;  %s175_s18 = smov 127   ;;  %s217_s1 = inlined_call_operand.vmem [shape: f32[4,3], index: 1, kind: input, shape index: {}]   ;;  %s218_s0 = inlined_call_operand.vmem [shape: f32[2,4,16], index: 0, kind: input, shape index: {}]   ;;  %s219_s2 = inlined_call_operand.vmem [shape: f32[8,4], index: 2, kind: input, shape index: {}]   ;;  %s220_s3 = inlined_call_operand.vmem [shape: f32[1,8,2], index: 3, kind: output, shape index: {}]  }
   0x1   :  { %166 = vset.pattern.permute.xlu1 %v170_v0  ;;  %v33_v1 = vld [vmem:[%s217_s1] sm:$0xf]  ;;  %168 = vset.pattern.permute.xlu2 %v171_v3  ;;  %v173_v4 = vmov 0.0   ;;  %v174_v5 = vmov 2   ;;  %v21_v6 = vld [vmem:[%s218_s0 + $0x4] sm:$0xf] }
   0x2   :  { %v20_v2 = vld [vmem:[%s218_s0] sm:$0xf]  ;;  %43 = vperm.xlu1 %166, %v33_v1   ;;  %38 = vperm.xlu2 %168, %v33_v1   ;;  %15 = vst.msk [vmem:[#allocation2] sm:$0xf] %vm14_vm0, %v173_v4  ;;  %vm30_vm2 = vcmask 134152   ;;  %s176_s19 = smov 126  }
   0x3   :  { %24 = vrot.lane.b32.xlu0 %v20_v2, %s172_s16  ;;  %18 = vst.msk [vmem:[#allocation2] sm:$0xf] %vm17_vm1, %v173_v4  ;;  %vm66_vm3 = vcmask 1043456   ;;  %v34_v23 = vld [vmem:[%s219_s2] sm:$0xff]  ;;  %vm62_vm4 = vcmask 31744   ;;  %vm90_vm5 = vcmask 130048  }
   0x4   :  { %169 = vset.pattern.permute.xlu0 %v174_v5  ;;  %16 = vst.msk [vmem:[#allocation2 + $0x4] sm:$0xf] %vm14_vm0, %v173_v4  ;;  %vm147_vm6 = vcmask 7168   ;;  %vm149_vm7 = vcmask 15368  }
   0x5   :  { %19 = vst.msk [vmem:[#allocation2 + $0x4] sm:$0xf] %vm17_vm1, %v173_v4 }
   0xa   :  { %167 = vset.pattern.permute.xlu1 %v174_v5 }
   0xb   :  { %26 = vrot.lane.b32.xlu0 %v21_v6, %s172_s16  ;;  %53 = vperm.xlu1 %167, %v33_v1  }
  0x5c   :  { %v39_v17 = vpop.permute.xlu2 %38 }
  0x74   :  { %v44_v8 = vpop.permute.xlu1 %43 }
  0x75   :  { %v25_v7 = vpop.permute.xlu0 %24 }
  0x76   :  { %31 = vst.msk [vmem:[#allocation2] sm:$0xf] %vm30_vm2, %v25_v7 }
  0x7d   :  { %v35_v9 = vld [vmem:[#allocation2] sm:$0xf]  ;;  %v27_v10 = vpop.permute.xlu0 %26  ;;  %v54_v12 = vpop.permute.xlu1 %53 }
  0x7e   :  { %v46_v11 = vmul.f32 %v44_v8, %v35_v9  ;;  %32 = vst.msk [vmem:[#allocation2 + $0x4] sm:$0xf] %vm30_vm2, %v27_v10  ;;  %v56_v13 = vmul.f32 %v54_v12, %v35_v9  ;;  %v41_v19 = vmul.f32 %v39_v17, %v35_v9 }
  0x80   :  { %48 = vrot.lane.b32.xlu2 %v46_v11, %s175_s18  ;;  %58 = vrot.lane.b32.xlu1 %v56_v13, %s176_s19 }
  0x85   :  { %v101_v14 = vld [vmem:[#allocation2 + $0x4] sm:$0xf] }
  0x86   :  { %v109_v15 = vmul.f32 %v101_v14, %v54_v12  ;;  %v103_v16 = vmul.f32 %v101_v14, %v44_v8  ;;  %v102_v24 = vmul.f32 %v101_v14, %v39_v17 }
  0x88   :  { %111 = vrot.lane.b32.xlu2 %v109_v15, %s176_s19  ;;  %105 = vrot.lane.b32.xlu0 %v103_v16, %s175_s18 }
  0xda   :  { %v49_v18 = vpop.permute.xlu2 %48 }
  0xdb   :  { %v51_v20 = vadd.f32 %v49_v18, %v41_v19 }
  0xe2   :  { %v112_v27 = vpop.permute.xlu2 %111 }
  0xf2   :  { %v59_v21 = vpop.permute.xlu1 %58 }
  0xf3   :  { %v61_v22 = vadd.f32 %v59_v21, %v51_v20 }
  0xf5   :  { %155 = vmatpush.msk.msra.mxu0 %vm66_vm3, %v61_v22 }
  0xf6   :  { %156 = vmatmul.msk.f32.vlgmr.msra.gmra.mxu0 %vm62_vm4, %v34_v23 }
  0xfa   :  { %v106_v25 = vpop.permute.xlu0 %105 }
  0xfb   :  { %v108_v26 = vadd.f32 %v106_v25, %v102_v24 }
  0xfd   :  { %v114_v28 = vadd.f32 %v112_v27, %v108_v26 }
  0xff   :  { %157 = vmatpush.msk.msra.mxu1 %vm66_vm3, %v114_v28 }
 0x100   :  { %158 = vmatmul.msk.f32.vlgmr.msra.gmra.mxu1 %vm62_vm4, %v34_v23 }
 0x173   :  { %v87_v29 = vpop.f32.mrf.mxu0 }
 0x174   :  { %v95_v30 = vmul.f32 %v87_v29, %v87_v29  ;;  %v91_v31 = vsel %vm90_vm5, %v87_v29, 0.0 }
 0x175   :  { %92 = vadd.xlane.f32.xlu0 %v91_v31 }
 0x176   :  { %v96_v32 = vsel %vm90_vm5, %v95_v30, 0.0 }
 0x177   :  { %97 = vadd.xlane.f32.xlu2 %v96_v32 }
 0x17d   :  { %v135_v33 = vpop.f32.mrf.mxu1 }
 0x17e   :  { %v142_v34 = vmul.f32 %v135_v33, %v135_v33  ;;  %v138_v35 = vsel %vm90_vm5, %v135_v33, 0.0 }
 0x17f   :  { %139 = vadd.xlane.f32.xlu1 %v138_v35 }
 0x180   :  { %v143_v36 = vsel %vm90_vm5, %v142_v34, 0.0 }
 0x181   :  { %144 = vadd.xlane.f32.xlu2 %v143_v36 }
 0x1e8   :  { %v93_v38 = vpop.xlane.xlu0 %92 }
 0x1ea   :  { %v98_v37 = vpop.xlane.xlu2 %97 }
 0x1f2   :  { %v140_v39 = vpop.xlane.xlu1 %139 }
 0x1f3   :  { %v141_v40 = vadd.f32 %v140_v39, %v93_v38 }
 0x1f4   :  { %v145_v41 = vpop.xlane.xlu2 %144 }
 0x1f5   :  { %148 = vst.msk [vmem:[%s220_s3] sm:$0xff] %vm147_vm6, %v141_v40  ;;  %v146_v42 = vadd.f32 %v145_v41, %v98_v37 }
 0x1f7   :  { %150 = vst.msk [vmem:[%s220_s3] sm:$0xff] %vm149_vm7, %v146_v42 }

// kernel: subblock_r.3
= control target key start
LH: loop header
LB: loop body
LE: loop exit
PB: predicated region body
PF: predicated region fallthrough
CT: control target
= control target key end

     0   :  { %v206_v2 = vmov 1   ;;  %s207_s19 = smov 1   ;;  %v208_v3 = vmov 0   ;;  %s259_s0 = inlined_call_operand.vmem [shape: f32[2,4,16], index: 0, kind: input, shape index: {}]   ;;  %s260_s1 = inlined_call_operand.vmem [shape: f32[4,3], index: 1, kind: input, shape index: {}]   ;;  %s261_s2 = inlined_call_operand.vmem [shape: f32[8,4], index: 2, kind: input, shape index: {}]   ;;  %s262_s3 = inlined_call_operand.vmem [shape: f32[8,1], index: 3, kind: input, shape index: {}]   ;;  %s263_s4 = inlined_call_operand.hbm [shape: f32[2,8,16], index: 4, kind: output, shape index: {}]  }
   0x1   :  { %v24_v0 = vld [vmem:[%s259_s0] sm:$0xf]  ;;  %176 = vset.pattern.permute.xlu1 %v206_v2  ;;  %178 = vset.pattern.permute.xlu2 %v208_v3 }
   0x2   :  { %v37_v1 = vld [vmem:[%s260_s1] sm:$0xf]  ;;  %28 = vrot.lane.b32.xlu0 %v24_v0, %s207_s19 }
   0x3   :  { %48 = vperm.xlu1 %176, %v37_v1  }
   0x4   :  { %9 = vsyncpa [#allocation4], 0  ;;  %43 = vperm.xlu2 %178, %v37_v1   ;;  %179 = vset.pattern.permute.xlu0 %v208_v3  ;;  %v25_v4 = vld [vmem:[%s259_s0 + $0x4] sm:$0xf]  ;;  %v209_v5 = vmov 2   ;;  %vm18_vm0 = vcmask 3072  }
   0x5   :  { %v210_v6 = vmov 0.0   ;;  %vm21_vm1 = vcmask 142472   ;;  %vm34_vm2 = vcmask 134152   ;;  %s211_s0 = smov 127   ;;  %s212_s1 = smov 126   ;;  %v39_v17 = vld [vmem:[%s262_s3] sm:$0xff] }
   0x6   :  { %19 = vst.msk [vmem:[#allocation2] sm:$0xf] %vm18_vm0, %v210_v6  ;;  %vm76_vm3 = vcmask 1043456   ;;  %v38_v24 = vld [vmem:[%s261_s2] sm:$0xff]  ;;  %vm72_vm4 = vcmask 31744   ;;  %vm101_vm5 = vcmask 130048  }
   0x7   :  { %22 = vst.msk [vmem:[#allocation2] sm:$0xf] %vm21_vm1, %v210_v6  ;;  %s213_s3 = smov [#allocation3]   ;;  %s150_s28 = sshll.u32 %s263_s4, 4  ;;  %s151_s28 = int_to_ptr.hbm [resolvable:$true] %s150_s28 }
   0x8   :  { %20 = vst.msk [vmem:[#allocation2 + $0x4] sm:$0xf] %vm18_vm0, %v210_v6  ;;  %s148_s26 = sshll.u32 %s213_s3, 4  ;;  %s214_s29 = smov 128   ;;  %s149_s26 = int_to_ptr.vmem [resolvable:$true] %s148_s26 }
   0x9   :  { %23 = vst.msk [vmem:[#allocation2 + $0x4] sm:$0xf] %vm21_vm1, %v210_v6  ;;  %s215_s30 = smov 8  }
   0xa   :  { %30 = vrot.lane.b32.xlu0 %v25_v4, %s207_s19 }
   0xb   :  { %177 = vset.pattern.permute.xlu1 %v209_v5 }
   0xc   :  { %58 = vperm.xlu1 %177, %v37_v1  }
  0x5e   :  { %v44_v18 = vpop.permute.xlu2 %43 }
  0x74   :  { %v29_v7 = vpop.permute.xlu0 %28 }
  0x75   :  { %35 = vst.msk [vmem:[#allocation2] sm:$0xf] %vm34_vm2, %v29_v7  ;;  %v49_v8 = vpop.permute.xlu1 %48 }
  0x7c   :  { %v40_v9 = vld [vmem:[#allocation2] sm:$0xf]  ;;  %v31_v10 = vpop.permute.xlu0 %30 }
  0x7d   :  { %v51_v11 = vmul.f32 %v49_v8, %v40_v9  ;;  %36 = vst.msk [vmem:[#allocation2 + $0x4] sm:$0xf] %vm34_vm2, %v31_v10  ;;  %v46_v20 = vmul.f32 %v44_v18, %v40_v9 }
  0x7e   :  { %v59_v12 = vpop.permute.xlu1 %58 }
  0x7f   :  { %v61_v13 = vmul.f32 %v59_v12, %v40_v9  ;;  %53 = vrot.lane.b32.xlu2 %v51_v11, %s211_s0 }
  0x81   :  { %63 = vrot.lane.b32.xlu1 %v61_v13, %s212_s1 }
  0x84   :  { %v104_v14 = vld [vmem:[#allocation2 + $0x4] sm:$0xf] }
  0x85   :  { %v112_v15 = vmul.f32 %v104_v14, %v59_v12  ;;  %v106_v16 = vmul.f32 %v104_v14, %v49_v8  ;;  %v105_v25 = vmul.f32 %v104_v14, %v44_v18 }
  0x87   :  { %108 = vrot.lane.b32.xlu0 %v106_v16, %s211_s0  ;;  %114 = vrot.lane.b32.xlu2 %v112_v15, %s212_s1 }
  0x8f   :  { %69 = vperm.xlu0 %179, %v39_v17  }
  0xd9   :  { %v54_v19 = vpop.permute.xlu2 %53 }
  0xda   :  { %v56_v21 = vadd.f32 %v54_v19, %v46_v20 }
  0xe1   :  { %v115_v28 = vpop.permute.xlu2 %114 }
  0xf3   :  { %v64_v22 = vpop.permute.xlu1 %63 }
  0xf4   :  { %v66_v23 = vadd.f32 %v64_v22, %v56_v21 }
  0xf6   :  { %162 = vmatpush.msk.msra.mxu0 %vm76_vm3, %v66_v23 }
  0xf7   :  { %163 = vmatmul.msk.f32.vlgmr.msra.gmra.mxu0 %vm72_vm4, %v38_v24 }
  0xf9   :  { %v109_v26 = vpop.permute.xlu0 %108 }
  0xfa   :  { %v111_v27 = vadd.f32 %v109_v26, %v105_v25 }
  0xfc   :  { %v117_v29 = vadd.f32 %v115_v28, %v111_v27 }
  0xfe   :  { %164 = vmatpush.msk.msra.mxu1 %vm76_vm3, %v117_v29 }
  0xff   :  { %165 = vmatmul.msk.f32.vlgmr.msra.gmra.mxu1 %vm72_vm4, %v38_v24 }
 0x101   :  { %v70_v30 = vpop.permute.xlu0 %69 }
 0x174   :  { %v97_v31 = vpop.f32.mrf.mxu0 }
 0x175   :  { %v98_v32 = vadd.f32 %v97_v31, %v70_v30 }
 0x177   :  { %v100_v33 = vmax.f32 %v98_v32, 0.0 }
 0x179   :  { %102 = vst.msk [vmem:[#allocation3] sm:$0xff] %vm101_vm5, %v100_v33 }
 0x17c   :  { %v138_v34 = vpop.f32.mrf.mxu1 }
 0x17d   :  { %v139_v35 = vadd.f32 %v138_v34, %v70_v30 }
 0x17f   :  { %v141_v36 = vmax.f32 %v139_v35, 0.0 }
 0x181   :  { %143 = vst.msk [vmem:[#allocation3 + $0x8] sm:$0xff] %vm101_vm5, %v141_v36 }
 0x182   :  { %156 = dma.vmem_to_hbm [thread:$0]  %s149_s26, 256, %s151_s28, [#allocation4], %s214_s29, %s214_s29, %s215_s30  }
 0x183   :  { %204 = dma.done.wait [#allocation4], 256  }
 0x184   :  { %205 = vsyncadd [#allocation4], 4294967040 }
 0x185   :  { %161 = vsyncpa [#allocation4], 1 }

</bundles_post_ra>
